<compile_context>
chip_gen: v6e
topology: v6e:2x2x1
jax: 0.10.0
libtpu: 0.0.40
codegen_flags: <defaults>
</compile_context>

<pallas_src>
import jax
import jax.numpy as jnp
from jax.experimental import pallas as pl
from jax.experimental.pallas import tpu as pltpu

NEG_SLOPE = 0.2   # LeakyReLU slope
BN_EPS = 1e-5     # nn.BatchNorm2d default eps
NCORES = 2        # leading 'parallel' grid axis for the stats pass (v7x megacore)
VMEM_LIMIT = 32 * 1024 * 1024


def _round_up(x, m):
    return ((x + m - 1) // m) * m


def _leaky_relu(x):
    return jnp.where(x > 0, x, NEG_SLOPE * x)


def _conv1_lrelu(xt_ref, w1_ref, b1_ref):
    """conv1 (1x1, tiny Cin) + bias + LeakyReLU as VPU broadcast-MACs (MXU left free).

    xt_ref: (Cin, TP) bf16 ; w1_ref: (ndf, Cin) f32 ; b1_ref: (ndf, 1) f32
    returns (ndf, TP) f32
    """
    cin = xt_ref.shape[0]
    x = xt_ref[...].astype(jnp.float32)                   # (Cin, TP)
    w1 = w1_ref[...]                                      # (ndf, Cin)
    h1 = b1_ref[...] + w1[:, 0:1] * x[0:1, :]             # (ndf, TP) broadcast-MAC
    for k in range(1, cin):                               # Cin is small & static
        h1 = h1 + w1[:, k:k + 1] * x[k:k + 1, :]
    return _leaky_relu(h1)


def _stats_kernel(xt_ref, w1_ref, b1_ref, s_ref, g_ref):
    """Pass 1: per-core sufficient statistics of h1 (no conv2, no per-tile mask).

    s = sum_p h1_p (ndf,1), G = sum_p h1_p h1_p^T (ndf,ndf). BN stats of h2 = W2 h1
    are recovered in the wrapper; padded columns are corrected in closed form there.
    """
    @pl.when(pl.program_id(1) == 0)
    def _():
        s_ref[...] = jnp.zeros_like(s_ref)
        g_ref[...] = jnp.zeros_like(g_ref)

    h1b = _conv1_lrelu(xt_ref, w1_ref, b1_ref).astype(jnp.bfloat16)   # (ndf, TP)
    s_ref[...] += jnp.sum(h1b.astype(jnp.float32), axis=1, keepdims=True)
    # Gram update: deep-K (K=TP) MXU matmul, f32 accumulation.
    g_ref[...] += jax.lax.dot_general(
        h1b, h1b, (((1,), (1,)), ((), ())), preferred_element_type=jnp.float32)


def _apply_kernel(xt_ref, w1_ref, b1_ref, w2t_ref, scale_ref, shift_ref, w3_ref,
                  out_ref):
    """Pass 2: conv1(VPU) + conv2(MXU, once per pixel) + folded BN + lrelu + conv3."""
    h1b = _conv1_lrelu(xt_ref, w1_ref, b1_ref).astype(jnp.bfloat16)   # (ndf, TP)
    h2 = jnp.dot(w2t_ref[...], h1b, preferred_element_type=jnp.float32)  # (c2, TP)
    h2 = _leaky_relu(h2 * scale_ref[...] + shift_ref[...])             # folded BN
    # conv3 (2ndf -> 1): VPU multiply + sublane (channel) reduction, lane-dense out.
    out_ref[...] = jnp.sum(h2 * w3_ref[...], axis=0, keepdims=True)    # (1, TP)


def init_params(key, input_nc, ndf):
    """Synthetic init (gaussian * 0.02 like cycleGAN's init_weights); nonzero b1 and
    non-trivial gamma/beta to exercise the padding-correction and BN-fold paths."""
    k1, kb, k2, kg, kbt, k3 = jax.random.split(key, 6)
    w1 = 0.02 * jax.random.normal(k1, (input_nc, ndf), jnp.float32)
    b1 = 0.02 * jax.random.normal(kb, (ndf,), jnp.float32)
    w2 = 0.02 * jax.random.normal(k2, (ndf, 2 * ndf), jnp.float32)
    gamma = 1.0 + 0.1 * jax.random.normal(kg, (2 * ndf,), jnp.float32)
    beta = 0.1 * jax.random.normal(kbt, (2 * ndf,), jnp.float32)
    w3 = 0.02 * jax.random.normal(k3, (2 * ndf,), jnp.float32)
    return (w1, b1, w2, gamma, beta, w3)


def pixel_discriminator(x_nchw, params, *, tp=4096):
    """Forward pass. x_nchw: (N, C, H, W) float32. Returns (N, 1, H, W) float32."""
    N, C, H, W = x_nchw.shape
    w1, b1, w2, gamma, beta, w3 = params
    ndf = w1.shape[1]
    c2 = w2.shape[1]

    P = N * H * W
    tp = _round_up(min(tp, _round_up(P, 128)), 128)
    ppad = _round_up(P, tp * NCORES)          # even split across the core axis
    num_tiles = ppad // tp
    tiles_per_core = num_tiles // NCORES
    n_pad = ppad - P

    # Layout plumbing: NCHW -> channel-major (C, P) so the pixel axis is lane-dense;
    # pad pixel axis; bf16 activation for the DMA/MXU boundary.
    xt = jnp.transpose(x_nchw, (1, 0, 2, 3)).reshape(C, P)
    xt = jnp.pad(xt, ((0, 0), (0, n_pad))).astype(jnp.bfloat16)

    w1r = w1.T.astype(jnp.float32)                  # (ndf, C)  f32 (conv1 is VPU)
    b1c = b1.reshape(ndf, 1).astype(jnp.float32)    # (ndf, 1)
    w2t = w2.T.astype(jnp.bfloat16)                 # (c2, ndf) bf16 (MXU)
    w3c = w3.reshape(c2, 1).astype(jnp.float32)     # (c2, 1)

    # ---- Pass 1: per-core {sum h1, Gram(h1)} over all pixel tiles -------------------
    s_part, g_part = pl.pallas_call(
        _stats_kernel,
        grid=(NCORES, tiles_per_core),
        in_specs=[
            pl.BlockSpec((C, tp), lambda c, i: (0, c * tiles_per_core + i)),
            pl.BlockSpec((ndf, C), lambda c, i: (0, 0)),
            pl.BlockSpec((ndf, 1), lambda c, i: (0, 0)),
        ],
        out_specs=[
            pl.BlockSpec((None, ndf, 1), lambda c, i: (c, 0, 0)),
            pl.BlockSpec((None, ndf, ndf), lambda c, i: (c, 0, 0)),
        ],
        out_shape=[jax.ShapeDtypeStruct((NCORES, ndf, 1), jnp.float32),
                   jax.ShapeDtypeStruct((NCORES, ndf, ndf), jnp.float32)],
        compiler_params=pltpu.CompilerParams(
            dimension_semantics=("parallel", "arbitrary"),  # core axis || reduction
            vmem_limit_bytes=VMEM_LIMIT),
    )(xt, w1r, b1c)

    # ---- Tiny wrapper-side BN fold (all f32, a few K flops) -------------------------
    # Closed-form removal of the padded (zero) pixels: each contributes h1_pad = lrelu(b1).
    h1_pad = _leaky_relu(b1).astype(jnp.bfloat16).astype(jnp.float32)        # (ndf,)
    s = jnp.sum(s_part, axis=0)[:, 0] - n_pad * h1_pad                        # (ndf,)
    G = jnp.sum(g_part, axis=0) - n_pad * jnp.outer(h1_pad, h1_pad)           # (ndf,ndf)

    w2f = w2t.astype(jnp.float32)                    # the exact bf16 values pass 2 uses
    hi = jax.lax.Precision.HIGHEST
    mean = jnp.dot(w2f, s, precision=hi) / P                                  # (c2,)
    e2 = jnp.einsum('ck,kl,cl->c', w2f, G, w2f, precision=hi) / P             # (c2,)
    var = e2 - mean * mean                           # biased variance (training-mode BN)
    inv = jax.lax.rsqrt(var + BN_EPS)
    scale = (gamma * inv).reshape(c2, 1)                                      # (c2, 1)
    shift = (beta - mean * gamma * inv).reshape(c2, 1)                        # (c2, 1)

    # ---- Pass 2: conv1(VPU) + conv2(MXU) + folded BN + lrelu + conv3, lane-dense out
    out = pl.pallas_call(
        _apply_kernel,
        grid=(num_tiles,),
        in_specs=[
            pl.BlockSpec((C, tp), lambda i: (0, i)),
            pl.BlockSpec((ndf, C), lambda i: (0, 0)),
            pl.BlockSpec((ndf, 1), lambda i: (0, 0)),
            pl.BlockSpec((c2, ndf), lambda i: (0, 0)),
            pl.BlockSpec((c2, 1), lambda i: (0, 0)),
            pl.BlockSpec((c2, 1), lambda i: (0, 0)),
            pl.BlockSpec((c2, 1), lambda i: (0, 0)),
        ],
        out_specs=pl.BlockSpec((1, tp), lambda i: (0, i)),
        out_shape=jax.ShapeDtypeStruct((1, ppad), jnp.float32),
        compiler_params=pltpu.CompilerParams(
            dimension_semantics=("parallel",),      # megacore-shard on v7x
            vmem_limit_bytes=VMEM_LIMIT),
    )(xt, w1r, b1c, w2t, scale, shift, w3c)

    # (1, Ppad) -> drop padding -> (N, 1, H, W)
    return out[0, :P].reshape(N, H, W)[:, None, :, :]


def _reference(x_nchw, params):
    """Pure-JAX reference with the same bf16 MXU-boundary casts as the kernel."""
    w1, b1, w2, gamma, beta, w3 = params
    N, C, H, W = x_nchw.shape
    x = jnp.transpose(x_nchw, (0, 2, 3, 1)).reshape(-1, C)
    x = x.astype(jnp.bfloat16).astype(jnp.float32)             # kernel DMAs x as bf16
    h = jnp.dot(x, w1, precision=jax.lax.Precision.HIGHEST) + b1[None, :]   # conv1 f32
    h = jnp.where(h > 0, h, NEG_SLOPE * h)
    h = jnp.dot(h.astype(jnp.bfloat16), w2.astype(jnp.bfloat16),
                preferred_element_type=jnp.float32)             # conv2 bf16 MXU
    mean = jnp.mean(h, axis=0)
    var = jnp.mean((h - mean) ** 2, axis=0)
    h = (h - mean) * jax.lax.rsqrt(var + BN_EPS) * gamma + beta
    h = jnp.where(h > 0, h, NEG_SLOPE * h)
    out = jnp.sum(h * w3[None, :], axis=1)                      # conv3 (no bias)
    return jnp.transpose(out.reshape(N, H, W, 1), (0, 3, 1, 2))


if __name__ == "__main__":
    input_nc = 4
    ndf = 64
    N, H, W = 2, 16, 16

    key = jax.random.PRNGKey(0)
    kx, kp = jax.random.split(key)
    x = jax.random.normal(kx, (N, input_nc, H, W), jnp.float32)
    params = init_params(kp, input_nc, ndf)

    y_ref = _reference(x, params)

    # Config 1: default tile -> padded pixel columns, exercises the closed-form
    # padding correction and the per-core partial-sum outputs.
    y = pixel_discriminator(x, params)
    jax.block_until_ready(y)
    assert y.shape == (N, 1, H, W), y.shape
    err = float(jnp.max(jnp.abs(y - y_ref)))
    assert err < 1e-2, f"max abs error {err}"

    # Config 2: small tile -> multi-tile grid, exercises cross-tile stats accumulation.
    y2 = pixel_discriminator(x, params, tp=128)
    jax.block_until_ready(y2)
    err2 = float(jnp.max(jnp.abs(y2 - y_ref)))
    assert err2 < 1e-2, f"max abs error {err2}"

    print("KERNEL_OK")
</pallas_src>

<mosaic_0001>
module attributes {stable_mosaic.version = 11 : i64} {
  func.func @_stats_kernel(%arg0: i32, %arg1: i32, %arg2: memref<4x512xbf16, #tpu.memory_space<vmem>>, %arg3: memref<64x4xf32, #tpu.memory_space<vmem>>, %arg4: memref<64x1xf32, #tpu.memory_space<vmem>>, %arg5: memref<1x64x1xf32, #tpu.memory_space<vmem>>, %arg6: memref<1x64x64xf32, #tpu.memory_space<vmem>>) attributes {dimension_semantics = [#tpu.dimension_semantics<parallel>, #tpu.dimension_semantics<arbitrary>], iteration_bounds = array<i64: 2, 1>, scalar_prefetch = 0 : i64, scratch_operands = 0 : i64, tpu.core_type = #tpu.core_type<tc>, window_params = [{transform_indices = @transform_0, window_bounds = array<i64: 4, 512>}, {pipeline_mode = #tpu.pipeline_mode<synchronous>, transform_indices = @transform_1, window_bounds = array<i64: 64, 4>}, {pipeline_mode = #tpu.pipeline_mode<synchronous>, transform_indices = @transform_2, window_bounds = array<i64: 64, 1>}, {transform_indices = @transform_3, window_bounds = array<i64: 1, 64, 1>}, {transform_indices = @transform_4, window_bounds = array<i64: 1, 64, 64>}]} {
    %c0_i32 = arith.constant 0 : i32
    %0 = arith.cmpi eq, %arg1, %c0_i32 : i32
    %1 = arith.extui %0 : i1 to i32
    %c0_i32_0 = arith.constant 0 : i32
    %2 = arith.cmpi ne, %1, %c0_i32_0 : i32
    scf.if %2 {
      %cst_21 = arith.constant 0.000000e+00 : f32
      %54 = vector.broadcast %cst_21 : f32 to vector<64x1xf32>
      %c0_22 = arith.constant 0 : index
      %c0_23 = arith.constant 0 : index
      %c0_24 = arith.constant 0 : index
      %55 = vector.load %arg5[%c0_22, %c0_23, %c0_24] : memref<1x64x1xf32, #tpu.memory_space<vmem>>, vector<1x64x1xf32>
      %56 = vector.shape_cast %55 : vector<1x64x1xf32> to vector<64x1xf32>
      %57 = vector.shape_cast %54 : vector<64x1xf32> to vector<1x64x1xf32>
      tpu.vector_store %arg5[%c0_22, %c0_23, %c0_24], %57 {strides = array<i32>} : memref<1x64x1xf32, #tpu.memory_space<vmem>>, vector<1x64x1xf32>,
      %cst_25 = arith.constant 0.000000e+00 : f32
      %58 = vector.broadcast %cst_25 : f32 to vector<64x64xf32>
      %c0_26 = arith.constant 0 : index
      %c0_27 = arith.constant 0 : index
      %c0_28 = arith.constant 0 : index
      %59 = vector.load %arg6[%c0_26, %c0_27, %c0_28] : memref<1x64x64xf32, #tpu.memory_space<vmem>>, vector<1x64x64xf32>
      %60 = vector.shape_cast %59 : vector<1x64x64xf32> to vector<64x64xf32>
      %61 = vector.shape_cast %58 : vector<64x64xf32> to vector<1x64x64xf32>
      tpu.vector_store %arg6[%c0_26, %c0_27, %c0_28], %61 {strides = array<i32>} : memref<1x64x64xf32, #tpu.memory_space<vmem>>, vector<1x64x64xf32>,
    } else {
    }
    %c0 = arith.constant 0 : index
    %c0_1 = arith.constant 0 : index
    %3 = vector.load %arg2[%c0, %c0_1] : memref<4x512xbf16, #tpu.memory_space<vmem>>, vector<4x512xbf16>
    %4 = arith.extf %3 : vector<4x512xbf16> to vector<4x512xf32>
    %c0_2 = arith.constant 0 : index
    %c0_3 = arith.constant 0 : index
    %5 = vector.load %arg3[%c0_2, %c0_3] : memref<64x4xf32, #tpu.memory_space<vmem>>, vector<64x4xf32>
    %c0_4 = arith.constant 0 : index
    %c0_5 = arith.constant 0 : index
    %6 = vector.load %arg4[%c0_4, %c0_5] : memref<64x1xf32, #tpu.memory_space<vmem>>, vector<64x1xf32>
    %7 = vector.extract_strided_slice %5 {offsets = [0, 0], sizes = [64, 1], strides = [1, 1]} : vector<64x4xf32> to vector<64x1xf32>
    %8 = vector.extract_strided_slice %4 {offsets = [0, 0], sizes = [1, 512], strides = [1, 1]} : vector<4x512xf32> to vector<1x512xf32>
    %9 = vector.broadcast %7 : vector<64x1xf32> to vector<64x512xf32>
    %10 = vector.broadcast %8 : vector<1x512xf32> to vector<64x512xf32>
    %11 = arith.mulf %9, %10 : vector<64x512xf32>
    %12 = vector.broadcast %6 : vector<64x1xf32> to vector<64x512xf32>
    %13 = arith.addf %12, %11 : vector<64x512xf32>
    %14 = vector.extract_strided_slice %5 {offsets = [0, 1], sizes = [64, 1], strides = [1, 1]} : vector<64x4xf32> to vector<64x1xf32>
    %15 = vector.extract_strided_slice %4 {offsets = [1, 0], sizes = [1, 512], strides = [1, 1]} : vector<4x512xf32> to vector<1x512xf32>
    %16 = vector.broadcast %14 : vector<64x1xf32> to vector<64x512xf32>
    %17 = vector.broadcast %15 : vector<1x512xf32> to vector<64x512xf32>
    %18 = arith.mulf %16, %17 : vector<64x512xf32>
    %19 = arith.addf %13, %18 : vector<64x512xf32>
    %20 = vector.extract_strided_slice %5 {offsets = [0, 2], sizes = [64, 1], strides = [1, 1]} : vector<64x4xf32> to vector<64x1xf32>
    %21 = vector.extract_strided_slice %4 {offsets = [2, 0], sizes = [1, 512], strides = [1, 1]} : vector<4x512xf32> to vector<1x512xf32>
    %22 = vector.broadcast %20 : vector<64x1xf32> to vector<64x512xf32>
    %23 = vector.broadcast %21 : vector<1x512xf32> to vector<64x512xf32>
    %24 = arith.mulf %22, %23 : vector<64x512xf32>
    %25 = arith.addf %19, %24 : vector<64x512xf32>
    %26 = vector.extract_strided_slice %5 {offsets = [0, 3], sizes = [64, 1], strides = [1, 1]} : vector<64x4xf32> to vector<64x1xf32>
    %27 = vector.extract_strided_slice %4 {offsets = [3, 0], sizes = [1, 512], strides = [1, 1]} : vector<4x512xf32> to vector<1x512xf32>
    %28 = vector.broadcast %26 : vector<64x1xf32> to vector<64x512xf32>
    %29 = vector.broadcast %27 : vector<1x512xf32> to vector<64x512xf32>
    %30 = arith.mulf %28, %29 : vector<64x512xf32>
    %31 = arith.addf %25, %30 : vector<64x512xf32>
    %cst = arith.constant 0.000000e+00 : f32
    %32 = vector.broadcast %cst : f32 to vector<64x512xf32>
    %33 = arith.cmpf ogt, %31, %32 : vector<64x512xf32>
    %cst_6 = arith.constant 2.000000e-01 : f32
    %34 = vector.broadcast %cst_6 : f32 to vector<64x512xf32>
    %35 = arith.mulf %34, %31 : vector<64x512xf32>
    %36 = arith.select %33, %31, %35 : vector<64x512xi1>, vector<64x512xf32>
    %37 = arith.truncf %36 : vector<64x512xf32> to vector<64x512xbf16>
    %c0_7 = arith.constant 0 : index
    %c0_8 = arith.constant 0 : index
    %c0_9 = arith.constant 0 : index
    %38 = vector.load %arg5[%c0_7, %c0_8, %c0_9] : memref<1x64x1xf32, #tpu.memory_space<vmem>>, vector<1x64x1xf32>
    %39 = vector.shape_cast %38 : vector<1x64x1xf32> to vector<64x1xf32>
    %40 = arith.extf %37 : vector<64x512xbf16> to vector<64x512xf32>
    %cst_10 = arith.constant dense<0.000000e+00> : vector<64xf32>
    %41 = vector.multi_reduction <add>, %40, %cst_10 [1] : vector<64x512xf32> to vector<64xf32>
    %42 = vector.shape_cast %41 : vector<64xf32> to vector<64x1xf32>
    %43 = arith.addf %39, %42 : vector<64x1xf32>
    %c0_11 = arith.constant 0 : index
    %c0_12 = arith.constant 0 : index
    %c0_13 = arith.constant 0 : index
    %44 = vector.load %arg5[%c0_11, %c0_12, %c0_13] : memref<1x64x1xf32, #tpu.memory_space<vmem>>, vector<1x64x1xf32>
    %45 = vector.shape_cast %44 : vector<1x64x1xf32> to vector<64x1xf32>
    %46 = vector.shape_cast %43 : vector<64x1xf32> to vector<1x64x1xf32>
    tpu.vector_store %arg5[%c0_11, %c0_12, %c0_13], %46 {strides = array<i32>} : memref<1x64x1xf32, #tpu.memory_space<vmem>>, vector<1x64x1xf32>,
    %c0_14 = arith.constant 0 : index
    %c0_15 = arith.constant 0 : index
    %c0_16 = arith.constant 0 : index
    %47 = vector.load %arg6[%c0_14, %c0_15, %c0_16] : memref<1x64x64xf32, #tpu.memory_space<vmem>>, vector<1x64x64xf32>
    %48 = vector.shape_cast %47 : vector<1x64x64xf32> to vector<64x64xf32>
    %cst_17 = arith.constant dense<0.000000e+00> : vector<64x64xf32>
    %49 = tpu.matmul %37, %37, %cst_17 {dimension_numbers = #tpu.dot_dimension_numbers<[1], [1], [0], [0], [0, 0, 1, 0], [], []>} : vector<64x512xbf16>, vector<64x512xbf16>, vector<64x64xf32> -> vector<64x64xf32>
    %50 = arith.addf %48, %49 : vector<64x64xf32>
    %c0_18 = arith.constant 0 : index
    %c0_19 = arith.constant 0 : index
    %c0_20 = arith.constant 0 : index
    %51 = vector.load %arg6[%c0_18, %c0_19, %c0_20] : memref<1x64x64xf32, #tpu.memory_space<vmem>>, vector<1x64x64xf32>
    %52 = vector.shape_cast %51 : vector<1x64x64xf32> to vector<64x64xf32>
    %53 = vector.shape_cast %50 : vector<64x64xf32> to vector<1x64x64xf32>
    tpu.vector_store %arg6[%c0_18, %c0_19, %c0_20], %53 {strides = array<i32>} : memref<1x64x64xf32, #tpu.memory_space<vmem>>, vector<1x64x64xf32>,
    return
  }
  func.func @transform_0(%arg0: i32, %arg1: i32) -> (i32, i32) {
    %c1_i32 = arith.constant 1 : i32
    %0 = arith.muli %arg0, %c1_i32 : i32
    %1 = arith.addi %0, %arg1 : i32
    %c0_i32 = arith.constant 0 : i32
    %c0_i32_0 = arith.constant 0 : i32
    return %c0_i32, %1 : i32, i32
  }
  func.func @transform_1(%arg0: i32, %arg1: i32) -> (i32, i32) {
    %c0_i32 = arith.constant 0 : i32
    %c0_i32_0 = arith.constant 0 : i32
    %c0_i32_1 = arith.constant 0 : i32
    return %c0_i32, %c0_i32_0 : i32, i32
  }
  func.func @transform_2(%arg0: i32, %arg1: i32) -> (i32, i32) {
    %c0_i32 = arith.constant 0 : i32
    %c0_i32_0 = arith.constant 0 : i32
    %c0_i32_1 = arith.constant 0 : i32
    return %c0_i32, %c0_i32_0 : i32, i32
  }
  func.func @transform_3(%arg0: i32, %arg1: i32) -> (i32, i32, i32) {
    %c0_i32 = arith.constant 0 : i32
    %c0_i32_0 = arith.constant 0 : i32
    %c0_i32_1 = arith.constant 0 : i32
    return %arg0, %c0_i32, %c0_i32_0 : i32, i32, i32
  }
  func.func @transform_4(%arg0: i32, %arg1: i32) -> (i32, i32, i32) {
    %c0_i32 = arith.constant 0 : i32
    %c0_i32_0 = arith.constant 0 : i32
    %c0_i32_1 = arith.constant 0 : i32
    return %arg0, %c0_i32, %c0_i32_0 : i32, i32, i32
  }
}

</mosaic_0001>

<bundles_post_ra>
// kernel: tpu_custom_call.1
= control target key start
LH: loop header
LB: loop body
LE: loop exit
PB: predicated region body
PF: predicated region fallthrough
CT: control target
= control target key end

     0   :  { %10 = vsyncpa [#allocation3], 0  ;;  %s2182_s0 = inlined_call_operand.vmem [shape: bf16[4,1024], index: 0, kind: input, shape index: {}]   ;;  %s2183_s1 = inlined_call_operand.vmem [shape: f32[64,4], index: 1, kind: input, shape index: {}]   ;;  %s2184_s2 = inlined_call_operand.vmem [shape: f32[64,1], index: 2, kind: input, shape index: {}]   ;;  %s2185_s3 = inlined_call_operand.vmem [shape: f32[2,64,1], index: 3, kind: output, shape index: {0}]   ;;  %s2186_s4 = inlined_call_operand.hbm [shape: f32[2,64,64], index: 4, kind: output, shape index: {1}]  }
   0x1   :  { %12 = vsyncpa [#allocation3 + $0x1], 0  ;;  %s1543_s15 = smov 0   ;;  %s1545_s16 = smov 0  }
   0x2   :  { %s1547_s17 = smov 0   ;;  %s1549_s18 = smov 0  }
   0x3   :  { %s1551_s19 = smov 0   ;;  %s1553_s20 = smov 0  }
   0x4 LB: > { %s1331_s21 = sadd.s32 4294967295, %s1508_s20   ;;  %s1332_s22 = sadd.s32 4294967294, %s1508_s20   ;;  %s1508_s20 = sphi %s1553_s20, %s18_s20   ;;  %s1504_s19 = sphi %s1551_s19, %s2220_s19   ;;  %s1500_s18 = sphi %s1549_s18, %s2219_s18   ;;  %s1496_s17 = sphi %s1547_s17, %s2218_s17   ;;  %s1492_s16 = sphi %s1545_s16, %s2217_s16   ;;  %s1488_s15 = sphi %s1543_s15, %s2216_s15  }
   0x5   : > { %s30_s23 = sadd.s32 1, %s1504_s19  ;;  %s133_s24 = sadd.s32 1, %s1496_s17 }
   0x6   : > { %p32_p0 = scmp.ge.s32.totalorder %s30_s23, 2  ;;  %p143_p1 = scmp.ne.s32.totalorder %s1496_s17, %s1492_s16 }
   0x7   : > { %p144_p2 = scmp.eq.s32.totalorder %s1331_s21, 1  ;;  %p149_p3 = scmp.ne.s32.totalorder %s1492_s16, %s1488_s15 }
   0x8   : > { %s2222_s23 = smov (%p32_p0, %s30_s23), 0  ;;  %p150_p5 = scmp.eq.s32.totalorder %s1332_s22, 1 }
   0x9   : > { %p1583_p4 = por %p144_p2, %p143_p1  ;;  %s130_s26 = ssub.s32 %s1504_s19, %s2222_s23 }
   0xa   : > { %p1335_p6 = scmp.ge.s32.totalorder %s1508_s20, 1  ;;  %p131_p7 = scmp.eq.s32.totalorder %s130_s26, 0 }
   0xb   : > { %p1590_p8 = por %p150_p5, %p149_p3  ;;  %p185_p9 = scmp.lt.s32.totalorder %s1508_s20, 3 }
   0xc   : > { %s1596_s28 = scalar_select %p131_p7, %s1496_s17, %s133_s24  }
   0xd   : > { %p186_p10 = pnand %p1335_p6, %p185_p9 }
   0xf   : > { %189 = sbr.rel (%p186_p10) target bundleno = 514 (0x202), region = 32 }
  0x14   : > { %v270_v0 = vld [vmem:[%s2184_s2 + $0x30] sm:$0xff]  ;;  %v1510_v2 = vmov 1   ;;  %v1511_v3 = vmov 0   ;;  %v271_v4 = vld [vmem:[%s2184_s2 + $0x38] sm:$0xff]  ;;  %v261_v5 = vld [vmem:[%s2183_s1 + $0x28] sm:$0xff]  ;;  %v1512_v8 = vmov 3   ;;  %v314_v22 = vlaneseq }
  0x15   : > { %v262_v1 = vld [vmem:[%s2183_s1 + $0x30] sm:$0xff]  ;;  %1411 = vset.pattern.permute.xlu0 %v1510_v2  ;;  %1410 = vset.pattern.permute.xlu1 %v1511_v3  ;;  %v263_v6 = vld [vmem:[%s2183_s1 + $0x38] sm:$0xff]  ;;  %v260_v7 = vld [vmem:[%s2183_s1 + $0x20] sm:$0xff]  ;;  %v1513_v9 = vmov 2   ;;  %s1337_s29 = sshll.u32 %s1500_s18, 2  ;;  %p225_p12 = scmp.lt.s32.totalorder %s1500_s18, 1 }
  0x16   : > { %414 = vperm.xlu1 %1410, %v270_v0   ;;  %479 = vperm.xlu0 %1411, %v262_v1   ;;  %v259_v10 = vld [vmem:[%s2183_s1 + $0x18] sm:$0xff]  ;;  %v268_v11 = vld [vmem:[%s2184_s2 + $0x20] sm:$0xff]  ;;  %v269_v12 = vld [vmem:[%s2184_s2 + $0x28] sm:$0xff]  ;;  %p219_p11 = scmp.lt.s32.totalorder %s1337_s29, 7  ;;  %v315_v25 = vshrl.u32 %v314_v22, 7  ;;  %vm235_vm0 = vcmask 7168  }
  0x17   : > { %v256_v13 = vld [vmem:[%s2183_s1] sm:$0xff]  ;;  %v265_v14 = vld [vmem:[%s2184_s2 + $0x8] sm:$0xff]  ;;  %v258_v15 = vld [vmem:[%s2183_s1 + $0x10] sm:$0xff]  ;;  %s226_s8 = scalar_select %p225_p12, %s1500_s18, 1 }
  0x18   : > { %v257_v16 = vld [vmem:[%s2183_s1 + $0x8] sm:$0xff]  ;;  %v266_v17 = vld [vmem:[%s2184_s2 + $0x10] sm:$0xff]  ;;  %v267_v18 = vld [vmem:[%s2184_s2 + $0x18] sm:$0xff]  ;;  %s2224_s29 = smov (!%p219_p11, %s1337_s29), 7  ;;  %v488_v27 = vsub.s32 1, %v315_v25  ;;  %v492_v28 = vsub.s32 5, %v315_v25 }
  0x19   : > { %v264_v19 = vld [vmem:[%s2184_s2] sm:$0xff]  ;;  %s1338_s30 = sshll.u32 %s2224_s29, 1  ;;  %v752_v33 = vsub.s32 3, %v315_v25  ;;  %v756_v34 = vsub.s32 7, %v315_v25  ;;  %v620_v35 = vsub.s32 2, %v315_v25  ;;  %v624_v36 = vsub.s32 6, %v315_v25 }
  0x1a   : > { %419 = vperm.xlu1 %1410, %v271_v4   ;;  %475 = vperm.xlu0 %1411, %v261_v5   ;;  %s222_s7 = scalar_lea.vmem %s2182_s0, %s1338_s30  ;;  %v316_v37 = vsub.s32 0, %v315_v25  ;;  %v320_v38 = vsub.s32 4, %v315_v25  ;;  %s1346_s9 = sshll.u32 %s226_s8, 6 }
  0x1b   : > { %v253_v26 = vld [vmem:[%s222_s7] sm:$0xff]  ;;  %s1786_s12 = scalar_lea.vmem %s2185_s3, %s1346_s9  ;;  %s214_s13 = sand.u32 1, %s1492_s16  }
  0x1c   : > { %v254_v29 = vunpack.c.l.bf16 %v253_v26  ;;  %v255_v30 = vunpack.c.h.bf16 %v253_v26  ;;  %s1336_s14 = sshll.u32 %s214_s13, 6  ;;  %s1347_s22 = sshll.u32 %s1500_s18, 10 }
  0x1d   : > { %s2052_s21 = scalar_lea.vmem [#allocation2], %s1336_s14  ;;  %s2129_s30 = scalar_lea.hbm %s2186_s4, %s1347_s22 }
  0x1e   : > { %1412 = vset.pattern.permute.xlu1 %v1510_v2  ;;  %1418 = vset.pattern.permute.xlu0 %v1512_v8  ;;  %v489_v39 = vrot.slane %v254_v29, %v488_v27  ;;  %v493_v40 = vrot.slane %v254_v29, %v492_v28  ;;  %v497_v41 = vrot.slane %v255_v30, %v488_v27  ;;  %s1236_s24 = sshll.u32 %s2052_s21, 4  ;;  %s2137_s18 = scalar_lea.sflag [#allocation3], %s214_s13  ;;  %s2131_s24 = int_to_ptr.vmem [resolvable:$true] %s1236_s24 }
  0x1f   : > { %483 = vperm.xlu1 %1412, %v263_v6   ;;  %735 = vperm.xlu0 %1418, %v260_v7   ;;  %v501_v42 = vrot.slane %v255_v30, %v492_v28  ;;  %v753_v43 = vrot.slane %v254_v29, %v752_v33  ;;  %v757_v44 = vrot.slane %v254_v29, %v756_v34  ;;  %s1432_s5 = scalar_lea.vmem %s2131_s24, 1024  ;;  %s1515_s6 = smov [#allocation2]  }
  0x20   : > { %v761_v45 = vrot.slane %v255_v30, %v752_v33  ;;  %v765_v46 = vrot.slane %v255_v30, %v756_v34  ;;  %v621_v49 = vrot.slane %v254_v29, %v620_v35  ;;  %v625_v50 = vrot.slane %v254_v29, %v624_v36  ;;  %p1433_p13 = scmp.ne.s32.totalorder %s2131_s24, %s1432_s5  ;;  %s1436_s7 = sshll.u32 %s1515_s6, 4  ;;  %s1437_s7 = int_to_ptr.vmem [resolvable:$false] %s1436_s7 }
  0x21   : > { %v629_v51 = vrot.slane %v255_v30, %v620_v35  ;;  %v633_v52 = vrot.slane %v255_v30, %v624_v36  ;;  %v317_v53 = vrot.slane %v254_v29, %v316_v37  ;;  %v321_v54 = vrot.slane %v254_v29, %v320_v38  ;;  %s1438_s8 = scalar_lea.vmem %s1437_s7, 2048  ;;  %p1439_p2 = scmp.lt.s32.totalorder %s2131_s24, %s1437_s7 }
  0x22   : > { %v325_v55 = vrot.slane %v255_v30, %v316_v37  ;;  %v329_v56 = vrot.slane %v255_v30, %v320_v38  ;;  %v1675_v57 = vrot.slane %v489_v39, %v488_v27  ;;  %v1677_v58 = vrot.slane %v493_v40, %v488_v27  ;;  %p1434_p0 = pnand %p1433_p13, %p1583_p4  ;;  %p1440_p3 = scmp.lt.s32.totalorder %s1438_s8, %s1432_s5 }
  0x23   : > { %1413 = vset.pattern.permute.xlu1 %v1513_v9  ;;  %1419 = vset.pattern.permute.xlu0 %v1513_v9  ;;  %v1679_v59 = vrot.slane %v497_v41, %v488_v27  ;;  %v1681_v60 = vrot.slane %v501_v42, %v488_v27  ;;  %v1683_v61 = vrot.slane %v753_v43, %v752_v33 }
  0x24   : > { %611 = vperm.xlu1 %1413, %v262_v1   ;;  %615 = vperm.xlu0 %1419, %v263_v6   ;;  %v1685_v62 = vrot.slane %v757_v44, %v752_v33  ;;  %v1687_v63 = vrot.slane %v761_v45, %v752_v33  ;;  %v1689_v0 = vrot.slane %v765_v46, %v752_v33  ;;  %p1435_p1 = pneg %p1434_p0  ;;  %p1441_p5 = por %p1440_p3, %p1439_p2 }
  0x25   : > { %v1697_v4 = vrot.slane %v629_v51, %v620_v35 }
  0x26   : > { %p1442_p6 = pnand %p1441_p5, %p1435_p1 }
  0x28   : > { %1414 = vset.pattern.permute.xlu1 %v1512_v8  ;;  %599 = vperm.xlu0 %1419, %v259_v10  }
  0x29   : > { %743 = vperm.xlu1 %1414, %v262_v1  }
  0x2c   : > { %1424 = vset.pattern.permute.xlu0 %v1511_v3 }
  0x2d   : > { %747 = vperm.xlu1 %1414, %v263_v6   ;;  %304 = vperm.xlu0 %1424, %v262_v1  }
  0x31   : > { %1415 = vset.pattern.permute.xlu1 %v1511_v3  ;;  %309 = vperm.xlu0 %1424, %v263_v6  }
  0x32   : > { %299 = vperm.xlu1 %1415, %v261_v5  }
  0x35   : > { %294 = vperm.xlu0 %1424, %v260_v7  }
  0x36   : > { %404 = vperm.xlu1 %1415, %v268_v11  }
  0x39   : > { %409 = vperm.xlu0 %1424, %v269_v12  }
  0x3a   : > { %1416 = vset.pattern.permute.xlu1 %v1510_v2 }
  0x3b   : > { %471 = vperm.xlu1 %1416, %v260_v7  }
  0x3d   : > { %289 = vperm.xlu0 %1424, %v259_v10  }
  0x3f   : > { %1417 = vset.pattern.permute.xlu1 %v1513_v9 }
  0x40   : > { %603 = vperm.xlu1 %1417, %v260_v7   ;;  %v1703_v7 = vrot.slane %v317_v53, %v316_v37 }
  0x41   : > { %274 = vperm.xlu0 %1424, %v256_v13  }
  0x42   : > { %2201 = vst [vmem:[#allocation7_spill] sm:$0xff] %v1703_v7 }
  0x44   : > { %607 = vperm.xlu1 %1417, %v261_v5  }
  0x45   : > { %389 = vperm.xlu0 %1424, %v265_v14  }
  0x48   : > { %1420 = vset.pattern.permute.xlu1 %v1512_v8 }
  0x49   : > { %739 = vperm.xlu1 %1420, %v261_v5   ;;  %1427 = vset.pattern.permute.xlu0 %v1510_v2  ;;  %v1699_v5 = vrot.slane %v633_v52, %v620_v35 }
  0x4a   : > { %463 = vperm.xlu0 %1427, %v258_v15  }
  0x4d   : > { %1421 = vset.pattern.permute.xlu1 %v1511_v3 }
  0x4e   : > { %284 = vperm.xlu1 %1421, %v258_v15   ;;  %459 = vperm.xlu0 %1427, %v257_v16  }
  0x52   : > { %394 = vperm.xlu1 %1421, %v266_v17   ;;  %1430 = vset.pattern.permute.xlu0 %v1512_v8 }
  0x53   : > { %719 = vperm.xlu0 %1430, %v256_v13  }
  0x56   : > { %399 = vperm.xlu1 %1421, %v267_v18  }
  0x5a   : > { %1422 = vset.pattern.permute.xlu1 %v1510_v2 }
  0x5b   : > { %467 = vperm.xlu1 %1422, %v259_v10  }
  0x5f   : > { %1423 = vset.pattern.permute.xlu1 %v1513_v9 }
  0x60   : > { %595 = vperm.xlu1 %1423, %v258_v15  }
  0x64   : > { %1425 = vset.pattern.permute.xlu1 %v1512_v8 }
  0x65   : > { %727 = vperm.xlu1 %1425, %v258_v15  }
  0x69   : > { %731 = vperm.xlu1 %1425, %v259_v10   ;;  %v1709_v10 = vrot.slane %v329_v56, %v316_v37 }
  0x6d   : > { %1426 = vset.pattern.permute.xlu1 %v1511_v3  ;;  %v1695_v3 = vrot.slane %v625_v50, %v620_v35 }
  0x6e   : > { %279 = vperm.xlu1 %1426, %v257_v16  }
  0x72   : > { %384 = vperm.xlu1 %1426, %v264_v19  }
  0x76   : > { %1428 = vset.pattern.permute.xlu1 %v1510_v2  ;;  %v1693_v2 = vrot.slane %v621_v49, %v620_v35 }
  0x77   : > { %455 = vperm.xlu1 %1428, %v256_v13  }
  0x7b   : > { %1429 = vset.pattern.permute.xlu1 %v1513_v9  ;;  %v1707_v9 = vrot.slane %v325_v55, %v316_v37 }
  0x7c   : > { %587 = vperm.xlu1 %1429, %v256_v13  }
  0x7d   : > { %2203 = vst [vmem:[#allocation9_spill] sm:$0xff] %v1707_v9 }
  0x80   : > { %591 = vperm.xlu1 %1429, %v257_v16  }
  0x84   : > { %1431 = vset.pattern.permute.xlu1 %v1512_v8  ;;  %v1705_v8 = vrot.slane %v321_v54, %v316_v37 }
  0x85   : > { %723 = vperm.xlu1 %1431, %v257_v16  }
  0x86   : > { %2202 = vst [vmem:[#allocation8_spill] sm:$0xff] %v1705_v8 }
  0x91   : > { %v1664_v20 = vpop.permute.xlu1 %414  ;;  %v480_v21 = vpop.permute.xlu0 %479 }
  0x92   : > { %v546_v11 = vmul.f32 %v1675_v57, %v480_v21  ;;  %v547_v12 = vmul.f32 %v1677_v58, %v480_v21  ;;  %v1714_v13 = vmul.f32 %v1679_v59, %v480_v21  ;;  %v549_v14 = vmul.f32 %v1681_v60, %v480_v21 }
  0x95   : > { %v1669_v23 = vpop.permute.xlu1 %419  ;;  %v476_v24 = vpop.permute.xlu0 %475 }
  0x96   : > { %v1718_v15 = vmul.f32 %v1675_v57, %v476_v24  ;;  %v1721_v16 = vmul.f32 %v1677_v58, %v476_v24  ;;  %v1724_v17 = vmul.f32 %v1679_v59, %v476_v24  ;;  %v1727_v18 = vmul.f32 %v1681_v60, %v476_v24 }
  0x9a   : > { %v484_v31 = vpop.permute.xlu1 %483  ;;  %v1671_v32 = vpop.permute.xlu0 %735 }
  0x9b   : > { %2199 = vst [vmem:[#allocation5_spill] sm:$0xff] %v1671_v32  ;;  %v1730_v19 = vmul.f32 %v1675_v57, %v484_v31  ;;  %v551_v22 = vmul.f32 %v1677_v58, %v484_v31  ;;  %v1734_v25 = vmul.f32 %v1679_v59, %v484_v31  ;;  %v553_v21 = vmul.f32 %v1681_v60, %v484_v31 }
  0x9c   : > { %v1739_v28 = vmul.f32 %v1683_v61, %v1671_v32  ;;  %v1743_v24 = vmul.f32 %v1685_v62, %v1671_v32  ;;  %v1747_v29 = vmul.f32 %v1687_v63, %v1671_v32 }
  0x9e   : > { %2204 = vst [vmem:[#allocation10_spill] sm:$0xff] %v1739_v28  ;;  %2205 = vst [vmem:[#allocation11_spill] sm:$0xff] %v1743_v24 }
  0x9f   : > { %v612_v47 = vpop.permute.xlu1 %611  ;;  %v1673_v48 = vpop.permute.xlu0 %615  ;;  %2206 = vst [vmem:[#allocation12_spill] sm:$0xff] %v1747_v29 }
  0xa0   : > { %v678_v30 = vmul.f32 %v1693_v2, %v612_v47  ;;  %v679_v36 = vmul.f32 %v1695_v3, %v612_v47  ;;  %v1756_v37 = vmul.f32 %v1697_v4, %v612_v47  ;;  %v681_v38 = vmul.f32 %v1699_v5, %v612_v47 }
  0xa1   : > { %v1761_v39 = vmul.f32 %v1693_v2, %v1673_v48  ;;  %v683_v40 = vmul.f32 %v1695_v3, %v1673_v48  ;;  %v684_v51 = vmul.f32 %v1697_v4, %v1673_v48 }
  0xa3   : > { %v1691_v1 = vpop.permute.xlu0 %599 }
  0xa4   : > { %2200 = vst [vmem:[#allocation6_spill] sm:$0xff] %v1691_v1  ;;  %v1701_v6 = vpop.permute.xlu1 %743 }
  0xa8   : > { %v748_v26 = vpop.permute.xlu1 %747  ;;  %v305_v27 = vpop.permute.xlu0 %304 }
  0xa9   : > { %v374_v33 = vmul.f32 %v1703_v7, %v305_v27  ;;  %v375_v31 = vmul.f32 %v1705_v8, %v305_v27  ;;  %v376_v34 = vmul.f32 %v1707_v9, %v305_v27  ;;  %v377_v35 = vmul.f32 %v1709_v10, %v305_v27 }
  0xaa   : > { %v685_v27 = vmul.f32 %v1699_v5, %v1673_v48  ;;  %v1796_v48 = vmul.f32 %v1687_v63, %v1701_v6 }
  0xab   : > { %v446_v41 = vadd.f32 %v1664_v20, %v374_v33  ;;  %v447_v42 = vadd.f32 %v1664_v20, %v375_v31  ;;  %v449_v43 = vadd.f32 %v1664_v20, %v377_v35  ;;  %v448_v52 = vadd.f32 %v1664_v20, %v376_v34 }
  0xac   : > { %v310_v44 = vpop.permute.xlu0 %309  ;;  %v1790_v20 = vmul.f32 %v1683_v61, %v1701_v6  ;;  %v1825_v34 = vmul.f32 %v1683_v61, %v748_v26 }
  0xad   : > { %v378_v45 = vmul.f32 %v1703_v7, %v310_v44  ;;  %v379_v46 = vmul.f32 %v1705_v8, %v310_v44  ;;  %v380_v47 = vmul.f32 %v1707_v9, %v310_v44  ;;  %v381_v49 = vmul.f32 %v1709_v10, %v310_v44  ;;  %v300_v50 = vpop.permute.xlu1 %299 }
  0xae   : > { %v578_v33 = vadd.f32 %v546_v11, %v446_v41  ;;  %v579_v31 = vadd.f32 %v547_v12, %v447_v42  ;;  %v581_v35 = vadd.f32 %v549_v14, %v449_v43  ;;  %v2187_v14 = vmov 0.0  }
  0xaf   : > { %v450_v53 = vadd.f32 %v1669_v23, %v378_v45  ;;  %v451_v54 = vadd.f32 %v1669_v23, %v379_v46  ;;  %v452_v55 = vadd.f32 %v1669_v23, %v380_v47  ;;  %v453_v56 = vadd.f32 %v1669_v23, %v381_v49  ;;  %237 = vst.msk [vmem:[%s1786_s12 + $0x8] sm:$0xff] %vm235_vm0, %v2187_v14 }
  0xb0   : > { %v295_v44 = vpop.permute.xlu0 %294  ;;  %v811_v23 = vmul.f32 %v1685_v62, %v1701_v6  ;;  %236 = vst.msk [vmem:[%s1786_s12] sm:$0xff] %vm235_vm0, %v2187_v14  ;;  %238 = vst.msk [vmem:[%s1786_s12 + $0x10] sm:$0xff] %vm235_vm0, %v2187_v14  ;;  %v815_v41 = vmul.f32 %v1685_v62, %v748_v26  ;;  %v1829_v43 = vmul.f32 %v1687_v63, %v748_v26 }
  0xb1   : > { %v583_v11 = vadd.f32 %v551_v22, %v451_v54  ;;  %v405_v12 = vpop.permute.xlu1 %404  ;;  %239 = vst.msk [vmem:[%s1786_s12 + $0x18] sm:$0xff] %vm235_vm0, %v2187_v14  ;;  %240 = vst.msk [vmem:[%s1786_s12 + $0x20] sm:$0xff] %vm235_vm0, %v2187_v14  ;;  %v813_v22 = vmul.f32 %v1689_v0, %v1701_v6  ;;  %v585_v42 = vadd.f32 %v553_v21, %v453_v56 }
  0xb2   : > { %241 = vst.msk [vmem:[%s1786_s12 + $0x28] sm:$0xff] %vm235_vm0, %v2187_v14  ;;  %242 = vst.msk [vmem:[%s1786_s12 + $0x30] sm:$0xff] %vm235_vm0, %v2187_v14  ;;  %v580_v45 = vadd.f32 %v1714_v13, %v448_v52  ;;  %v582_v46 = vadd.f32 %v1730_v19, %v450_v53  ;;  %v584_v47 = vadd.f32 %v1734_v25, %v452_v55 }
  0xb3   : > { %243 = vst.msk [vmem:[%s1786_s12 + $0x38] sm:$0xff] %vm235_vm0, %v2187_v14  ;;  %v817_v49 = vmul.f32 %v1689_v0, %v748_v26  ;;  %v710_v54 = vadd.f32 %v678_v30, %v578_v33  ;;  %v711_v14 = vadd.f32 %v679_v36, %v579_v31  ;;  %v713_v6 = vadd.f32 %v681_v38, %v581_v35 }
  0xb4   : > { %v715_v1 = vadd.f32 %v683_v40, %v583_v11  ;;  %v370_v29 = vmul.f32 %v1703_v7, %v300_v50  ;;  %v371_v28 = vmul.f32 %v1705_v8, %v300_v50  ;;  %v366_v21 = vmul.f32 %v1703_v7, %v295_v44  ;;  %v410_v56 = vpop.permute.xlu0 %409 }
  0xb5   : > { %v717_v24 = vadd.f32 %v685_v27, %v585_v42  ;;  %v372_v13 = vmul.f32 %v1707_v9, %v300_v50  ;;  %v367_v19 = vmul.f32 %v1705_v8, %v295_v44  ;;  %v368_v25 = vmul.f32 %v1707_v9, %v295_v44 }
  0xb6   : > { %v472_v52 = vpop.permute.xlu1 %471  ;;  %v712_v26 = vadd.f32 %v1756_v37, %v580_v45  ;;  %v714_v30 = vadd.f32 %v1761_v39, %v582_v46  ;;  %v716_v36 = vadd.f32 %v684_v51, %v584_v47  ;;  %v373_v38 = vmul.f32 %v1709_v10, %v300_v50 }
  0xb7   : > { %v369_v40 = vmul.f32 %v1709_v10, %v295_v44  ;;  %v442_v53 = vadd.f32 %v410_v56, %v370_v29  ;;  %v443_v55 = vadd.f32 %v410_v56, %v371_v28  ;;  %v444_v33 = vadd.f32 %v410_v56, %v372_v13 }
  0xb8   : > { %v438_v27 = vadd.f32 %v405_v12, %v366_v21  ;;  %v445_v31 = vadd.f32 %v410_v56, %v373_v38  ;;  %v843_v35 = vadd.f32 %v811_v23, %v711_v14  ;;  %v847_v11 = vadd.f32 %v815_v41, %v715_v1 }
  0xb9   : > { %v439_v42 = vadd.f32 %v405_v12, %v367_v19  ;;  %v440_v7 = vadd.f32 %v405_v12, %v368_v25  ;;  %v845_v9 = vadd.f32 %v813_v22, %v713_v6  ;;  %v849_v8 = vadd.f32 %v817_v49, %v717_v24 }
  0xba   : > { %vm875_vm1 = vcmp.gt.f32.partialorder %v843_v35, 0.0  ;;  %vm879_vm2 = vcmp.gt.f32.partialorder %v847_v11, 0.0  ;;  %v907_v37 = vmul.f32 0.2, %v843_v35  ;;  %v911_v39 = vmul.f32 0.2, %v847_v11 }
  0xbb   : > { %v604_v32 = vpop.permute.xlu1 %603  ;;  %v441_v51 = vadd.f32 %v405_v12, %v369_v40  ;;  %v538_v50 = vmul.f32 %v1675_v57, %v472_v52  ;;  %v539_v29 = vmul.f32 %v1677_v58, %v472_v52  ;;  %v540_v28 = vmul.f32 %v1679_v59, %v472_v52 }
  0xbc   : > { %v1849_v44 = vadd.f32 %v1718_v15, %v442_v53  ;;  %v575_v1 = vadd.f32 %v1721_v16, %v443_v55  ;;  %v1853_v23 = vadd.f32 %v1724_v17, %v444_v33  ;;  %v943_v24 = vsel %vm879_vm2, %v847_v11, %v911_v39  ;;  %v1875_v53 = vpop.permute.xlu0 %289 }
  0xbd   : > { %v541_v14 = vmul.f32 %v1681_v60, %v472_v52  ;;  %v939_v22 = vsel %vm875_vm1, %v843_v35, %v907_v37  ;;  %vm877_vm3 = vcmp.gt.f32.partialorder %v845_v9, 0.0  ;;  %vm881_vm4 = vcmp.gt.f32.partialorder %v849_v8, 0.0 }
  0xbe   : > { %v1856_v12 = vpack.c.bf16 %v943_v24, %v939_v22  ;;  %v909_v41 = vmul.f32 0.2, %v845_v9  ;;  %v913_v45 = vmul.f32 0.2, %v849_v8  ;;  %v842_v46 = vadd.f32 %v1790_v20, %v710_v54 }
  0xbf   : > { %v608_v47 = vpop.permute.xlu1 %607  ;;  %v577_v15 = vadd.f32 %v1727_v18, %v445_v31  ;;  %v570_v49 = vadd.f32 %v538_v50, %v438_v27  ;;  %v571_v16 = vadd.f32 %v539_v29, %v439_v42  ;;  %v572_v6 = vadd.f32 %v540_v28, %v440_v7  ;;  %v2207_v28 = vld [vmem:[#allocation5_spill] sm:$0xff] }
  0xc0   : > { %1075 = vmatprep.subr.bf16.mxu0 %v1856_v12  ;;  %v941_v17 = vsel %vm877_vm3, %v845_v9, %v909_v41  ;;  %v945_v21 = vsel %vm881_vm4, %v849_v8, %v913_v45  ;;  %v846_v56 = vadd.f32 %v1825_v34, %v714_v30  ;;  %vm874_vm5 = vcmp.gt.f32.partialorder %v842_v46, 0.0 }
  0xc1   : > { %v1862_v13 = vpack.c.bf16 %v945_v21, %v941_v17  ;;  %v906_v19 = vmul.f32 0.2, %v842_v46  ;;  %v844_v25 = vadd.f32 %v1796_v48, %v712_v26  ;;  %v848_v20 = vadd.f32 %v1829_v43, %v716_v36  ;;  %v1894_v21 = vpop.permute.xlu0 %274 }
  0xc2   : > { %v573_v54 = vadd.f32 %v541_v14, %v441_v51  ;;  %v671_v18 = vmul.f32 %v1695_v3, %v604_v32  ;;  %vm878_vm6 = vcmp.gt.f32.partialorder %v846_v56, 0.0  ;;  %v910_v52 = vmul.f32 0.2, %v846_v56 }
  0xc3   : > { %1140 = vmatprep.subr.bf16.mxu1 %v1862_v13  ;;  %vm876_vm7 = vcmp.gt.f32.partialorder %v844_v25, 0.0  ;;  %vm880_vm8 = vcmp.gt.f32.partialorder %v848_v20, 0.0  ;;  %v908_v7 = vmul.f32 0.2, %v844_v25  ;;  %v675_v8 = vmul.f32 %v1695_v3, %v608_v47 }
  0xc4   : > { %v740_v9 = vpop.permute.xlu1 %739  ;;  %v938_v34 = vsel %vm874_vm5, %v842_v46, %v906_v19  ;;  %v942_v30 = vsel %vm878_vm6, %v846_v56, %v910_v52  ;;  %v912_v38 = vmul.f32 0.2, %v848_v20  ;;  %v677_v48 = vmul.f32 %v1699_v5, %v608_v47 }
  0xc5   : > { %v670_v43 = vmul.f32 %v1693_v2, %v604_v32  ;;  %v673_v26 = vmul.f32 %v1699_v5, %v604_v32  ;;  %v1872_v36 = vpack.c.bf16 %v942_v30, %v938_v34  ;;  %v674_v40 = vmul.f32 %v1693_v2, %v608_v47  ;;  %v1898_v34 = vpop.permute.xlu0 %389 }
  0xc6   : > { %v672_v55 = vmul.f32 %v1697_v4, %v604_v32  ;;  %v940_v33 = vsel %vm876_vm7, %v844_v25, %v908_v7  ;;  %v944_v27 = vsel %vm880_vm8, %v848_v20, %v912_v38  ;;  %v676_v31 = vmul.f32 %v1697_v4, %v608_v47 }
  0xc7   : > { %v703_v35 = vadd.f32 %v671_v18, %v571_v16  ;;  %1076 = vmatpush1.bf16.xpose.msra.mxu0 %v1872_v36  ;;  %v1880_v11 = vpack.c.bf16 %v944_v27, %v940_v33  ;;  %v707_v42 = vadd.f32 %v675_v8, %v575_v1  ;;  %v709_v37 = vadd.f32 %v677_v48, %v577_v15  ;;  %v2208_v15 = vld [vmem:[#allocation11_spill] sm:$0xff]  ;;  %v2210_v18 = vld [vmem:[#allocation12_spill] sm:$0xff] }
  0xc8   : > { %v806_v39 = vmul.f32 %v1683_v61, %v740_v9  ;;  %v807_v51 = vmul.f32 %v1685_v62, %v740_v9  ;;  %v808_v50 = vmul.f32 %v1687_v63, %v740_v9  ;;  %v809_v29 = vmul.f32 %v1689_v0, %v740_v9 }
  0xc9   : > { %v1886_v32 = vpop.permute.xlu1 %284  ;;  %v805_v24 = vmul.f32 %v1689_v0, %v2207_v28  ;;  %v702_v14 = vadd.f32 %v670_v43, %v570_v49  ;;  %v705_v22 = vadd.f32 %v673_v26, %v573_v54  ;;  %1141 = vmatpush1.bf16.xpose.msra.mxu1 %v1880_v11  ;;  %v706_v1 = vadd.f32 %v674_v40, %v1849_v44  ;;  %v2209_v49 = vld [vmem:[#allocation10_spill] sm:$0xff] }
  0xca   : > { %v704_v41 = vadd.f32 %v672_v55, %v572_v6  ;;  %v708_v45 = vadd.f32 %v676_v31, %v1853_v23  ;;  %v839_v46 = vadd.f32 %v807_v51, %v707_v42  ;;  %v841_v47 = vadd.f32 %v809_v29, %v709_v37  ;;  %v2211_v51 = vld [vmem:[#allocation6_spill] sm:$0xff]  ;;  %v464_v29 = vpop.permute.xlu0 %463 }
  0xcb   : > { %v835_v16 = vadd.f32 %v2208_v15, %v703_v35  ;;  %v838_v17 = vadd.f32 %v806_v39, %v706_v1  ;;  %v837_v20 = vadd.f32 %v805_v24, %v705_v22  ;;  %v834_v54 = vadd.f32 %v2209_v49, %v702_v14  ;;  %v2212_v1 = vld [vmem:[#allocation8_spill] sm:$0xff] }
  0xcc   : > { %v840_v56 = vadd.f32 %v808_v50, %v708_v45  ;;  %v903_v19 = vmul.f32 0.2, %v839_v46  ;;  %v836_v52 = vadd.f32 %v2210_v18, %v704_v41  ;;  %v905_v7 = vmul.f32 0.2, %v841_v47  ;;  %v2213_v45 = vld [vmem:[#allocation7_spill] sm:$0xff] }
  0xcd   : > { %v395_v25 = vpop.permute.xlu1 %394  ;;  %v902_v44 = vmul.f32 0.2, %v838_v17  ;;  %vm867_vm9 = vcmp.gt.f32.partialorder %v835_v16, 0.0  ;;  %vm871_vm10 = vcmp.gt.f32.partialorder %v839_v46, 0.0  ;;  %v899_v23 = vmul.f32 0.2, %v835_v16 }
  0xce   : > { %v904_v6 = vmul.f32 0.2, %v840_v56  ;;  %v935_v8 = vsel %vm871_vm10, %v839_v46, %v903_v19  ;;  %vm869_vm11 = vcmp.gt.f32.partialorder %v837_v20, 0.0  ;;  %vm873_vm12 = vcmp.gt.f32.partialorder %v841_v47, 0.0 }
  0xcf   : > { %v931_v30 = vsel %vm867_vm9, %v835_v16, %v899_v23  ;;  %v901_v38 = vmul.f32 0.2, %v837_v20  ;;  %v937_v43 = vsel %vm873_vm12, %v841_v47, %v905_v7  ;;  %vm866_vm13 = vcmp.gt.f32.partialorder %v834_v54, 0.0 }
  0xd0   : > { %v1900_v48 = vpack.c.bf16 %v935_v8, %v931_v30  ;;  %vm870_vm14 = vcmp.gt.f32.partialorder %v838_v17, 0.0  ;;  %v898_v40 = vmul.f32 0.2, %v834_v54  ;;  %vm868_vm15 = vcmp.gt.f32.partialorder %v836_v52, 0.0 }
  0xd1   : > { %v400_v9 = vpop.permute.xlu1 %399  ;;  %v933_v26 = vsel %vm869_vm11, %v837_v20, %v901_v38  ;;  %v934_v55 = vsel %vm870_vm14, %v838_v17, %v902_v44  ;;  %vm872_vm1 = vcmp.gt.f32.partialorder %v840_v56, 0.0  ;;  %v900_v27 = vmul.f32 0.2, %v836_v52  ;;  %v2214_v17 = vld [vmem:[#allocation9_spill] sm:$0xff] }
  0xd2   : > { %1077 = vmatprep.subr.bf16.mxu0 %v1900_v48  ;;  %v1903_v33 = vpack.c.bf16 %v937_v43, %v933_v26  ;;  %v930_v31 = vsel %vm866_vm13, %v834_v54, %v898_v40  ;;  %v936_v35 = vsel %vm872_vm1, %v840_v56, %v904_v6  ;;  %v666_v50 = vmul.f32 %v1693_v2, %v2211_v51 }
  0xd3   : > { %v1906_v37 = vpack.c.bf16 %v934_v55, %v930_v31  ;;  %v932_v39 = vsel %vm868_vm15, %v836_v52, %v900_v27  ;;  %v667_v24 = vmul.f32 %v1695_v3, %v2211_v51  ;;  %v668_v14 = vmul.f32 %v1697_v4, %v2211_v51 }
  0xd4   : > { %1142 = vmatprep.subr.bf16.mxu1 %v1903_v33  ;;  %v1910_v28 = vpack.c.bf16 %v936_v35, %v932_v39  ;;  %v669_v22 = vmul.f32 %v1699_v5, %v2211_v51  ;;  %v359_v41 = vmul.f32 %v2212_v1, %v1886_v32  ;;  %v362_v46 = vmul.f32 %v2213_v45, %v1875_v53 }
  0xd5   : > { %1078 = vmatpush1.bf16.xpose.msra.mxu0 %v1906_v37  ;;  %v363_v47 = vmul.f32 %v2212_v1, %v1875_v53  ;;  %v365_v15 = vmul.f32 %v1709_v10, %v1875_v53  ;;  %v358_v16 = vmul.f32 %v2213_v45, %v1886_v32  ;;  %v360_v56 = vmul.f32 %v2214_v17, %v1886_v32 }
  0xd6   : > { %v468_v42 = vpop.permute.xlu1 %467  ;;  %1143 = vmatpush1.bf16.xpose.msra.mxu1 %v1910_v28  ;;  %v361_v19 = vmul.f32 %v1709_v10, %v1886_v32  ;;  %v431_v20 = vadd.f32 %v395_v25, %v359_v41  ;;  %v531_v49 = vmul.f32 %v1677_v58, %v464_v29  ;;  %v364_v18 = vmul.f32 %v2214_v17, %v1875_v53 }
  0xd7   : > { %v530_v52 = vmul.f32 %v1675_v57, %v464_v29  ;;  %v534_v7 = vmul.f32 %v1675_v57, %v468_v42  ;;  %v535_v44 = vmul.f32 %v1677_v58, %v468_v42  ;;  %v430_v23 = vadd.f32 %v395_v25, %v358_v16 }
  0xd8   : > { %v432_v6 = vadd.f32 %v395_v25, %v360_v56  ;;  %v433_v8 = vadd.f32 %v395_v25, %v361_v19  ;;  %v537_v30 = vmul.f32 %v1681_v60, %v468_v42  ;;  %v532_v32 = vmul.f32 %v1679_v59, %v464_v29 }
  0xd9   : > { %v434_v38 = vadd.f32 %v400_v9, %v362_v46  ;;  %v435_v43 = vadd.f32 %v400_v9, %v363_v47  ;;  %v533_v40 = vmul.f32 %v1681_v60, %v464_v29  ;;  %v563_v53 = vadd.f32 %v531_v49, %v431_v20 }
  0xda   : > { %v437_v55 = vadd.f32 %v400_v9, %v365_v15  ;;  %v536_v27 = vmul.f32 %v1679_v59, %v468_v42  ;;  %v436_v31 = vadd.f32 %v400_v9, %v364_v18  ;;  %v562_v56 = vadd.f32 %v530_v52, %v430_v23 }
  0xdb   : > { %v596_v54 = vpop.permute.xlu1 %595  ;;  %v566_v35 = vadd.f32 %v534_v7, %v434_v38  ;;  %v567_v39 = vadd.f32 %v535_v44, %v435_v43  ;;  %v564_v19 = vadd.f32 %v532_v32, %v432_v6  ;;  %v565_v20 = vadd.f32 %v533_v40, %v433_v8 }
  0xdc   : > { %v663_v26 = vmul.f32 %v1695_v3, %v596_v54  ;;  %v662_v51 = vmul.f32 %v1693_v2, %v596_v54  ;;  %v569_v41 = vadd.f32 %v537_v30, %v437_v55  ;;  %v664_v16 = vmul.f32 %v1697_v4, %v596_v54 }
  0xdd   : > { %v665_v46 = vmul.f32 %v1699_v5, %v596_v54  ;;  %v568_v42 = vadd.f32 %v536_v27, %v436_v31  ;;  %v698_v30 = vadd.f32 %v666_v50, %v566_v35  ;;  %v699_v38 = vadd.f32 %v667_v24, %v567_v39 }
  0xde   : > { %v695_v29 = vadd.f32 %v663_v26, %v563_v53  ;;  %v694_v18 = vadd.f32 %v662_v51, %v562_v56  ;;  %v696_v43 = vadd.f32 %v664_v16, %v564_v19  ;;  %v701_v55 = vadd.f32 %v669_v22, %v569_v41 }
  0xdf   : > { %v697_v54 = vadd.f32 %v665_v46, %v565_v20  ;;  %v700_v53 = vadd.f32 %v668_v14, %v568_v42  ;;  %v350_v42 = vmul.f32 %v2213_v45, %v1894_v21 }
  0xe0   : > { %v728_v25 = vpop.permute.xlu1 %727 }
  0xe1   : > { %v795_v47 = vmul.f32 %v1685_v62, %v728_v25  ;;  %v794_v15 = vmul.f32 %v1683_v61, %v728_v25  ;;  %v796_v9 = vmul.f32 %v1687_v63, %v728_v25  ;;  %v797_v49 = vmul.f32 %v1689_v0, %v728_v25 }
  0xe3   : > { %v827_v7 = vadd.f32 %v795_v47, %v695_v29  ;;  %v826_v23 = vadd.f32 %v794_v15, %v694_v18  ;;  %v828_v26 = vadd.f32 %v796_v9, %v696_v43  ;;  %v829_v40 = vadd.f32 %v797_v49, %v697_v54  ;;  %v460_v47 = vpop.permute.xlu0 %459 }
  0xe4   : > { %v732_v44 = vpop.permute.xlu1 %731  ;;  %v351_v9 = vmul.f32 %v2212_v1, %v1894_v21  ;;  %v352_v49 = vmul.f32 %v2214_v17, %v1894_v21  ;;  %v353_v18 = vmul.f32 %v1709_v10, %v1894_v21  ;;  %v527_v54 = vmul.f32 %v1677_v58, %v460_v47 }
  0xe5   : > { %v798_v52 = vmul.f32 %v1683_v61, %v732_v44  ;;  %v799_v6 = vmul.f32 %v1685_v62, %v732_v44  ;;  %v800_v8 = vmul.f32 %v1687_v63, %v732_v44  ;;  %v801_v32 = vmul.f32 %v1689_v0, %v732_v44 }
  0xe6   : > { %v891_v31 = vmul.f32 0.2, %v827_v7  ;;  %vm859_vm2 = vcmp.gt.f32.partialorder %v827_v7, 0.0  ;;  %v890_v22 = vmul.f32 0.2, %v826_v23  ;;  %vm861_vm5 = vcmp.gt.f32.partialorder %v829_v40, 0.0 }
  0xe7   : > { %v830_v27 = vadd.f32 %v798_v52, %v698_v30  ;;  %v831_v51 = vadd.f32 %v799_v6, %v699_v38  ;;  %v833_v50 = vadd.f32 %v801_v32, %v701_v55  ;;  %v832_v24 = vadd.f32 %v800_v8, %v700_v53  ;;  %v720_v8 = vpop.permute.xlu0 %719 }
  0xe8   : > { %v892_v41 = vmul.f32 0.2, %v828_v26  ;;  %v893_v16 = vmul.f32 0.2, %v829_v40  ;;  %v923_v56 = vsel %vm859_vm2, %v827_v7, %v891_v31  ;;  %vm858_vm6 = vcmp.gt.f32.partialorder %v826_v23, 0.0 }
  0xe9   : > { %v894_v35 = vmul.f32 0.2, %v830_v27  ;;  %v280_v39 = vpop.permute.xlu1 %279  ;;  %v895_v25 = vmul.f32 0.2, %v831_v51  ;;  %vm862_vm3 = vcmp.gt.f32.partialorder %v830_v27, 0.0  ;;  %vm863_vm4 = vcmp.gt.f32.partialorder %v831_v51, 0.0 }
  0xea   : > { %v897_v46 = vmul.f32 0.2, %v833_v50  ;;  %v896_v14 = vmul.f32 0.2, %v832_v24  ;;  %vm865_vm7 = vcmp.gt.f32.partialorder %v833_v50, 0.0  ;;  %v526_v7 = vmul.f32 %v1675_v57, %v460_v47 }
  0xeb   : > { %v927_v19 = vsel %vm863_vm4, %v831_v51, %v895_v25  ;;  %v926_v20 = vsel %vm862_vm3, %v830_v27, %v894_v35  ;;  %v925_v44 = vsel %vm861_vm5, %v829_v40, %v893_v16  ;;  %v922_v30 = vsel %vm858_vm6, %v826_v23, %v890_v22 }
  0xec   : > { %v1956_v15 = vpack.c.bf16 %v927_v19, %v923_v56  ;;  %v929_v38 = vsel %vm865_vm7, %v833_v50, %v897_v46  ;;  %v1969_v43 = vpack.c.bf16 %v926_v20, %v922_v30  ;;  %vm860_vm8 = vcmp.gt.f32.partialorder %v828_v26, 0.0 }
  0xed   : > { %v385_v29 = vpop.permute.xlu1 %384  ;;  %vm864_vm9 = vcmp.gt.f32.partialorder %v832_v24, 0.0  ;;  %v1972_v55 = vpack.c.bf16 %v929_v38, %v925_v44  ;;  %v924_v52 = vsel %vm860_vm8, %v828_v26, %v892_v41  ;;  %v354_v21 = vmul.f32 %v2213_v45, %v280_v39 }
  0xee   : > { %1079 = vmatprep.subr.bf16.mxu0 %v1956_v15  ;;  %v928_v6 = vsel %vm864_vm9, %v832_v24, %v896_v14  ;;  %v355_v32 = vmul.f32 %v2212_v1, %v280_v39  ;;  %v356_v53 = vmul.f32 %v2214_v17, %v280_v39  ;;  %v357_v45 = vmul.f32 %v1709_v10, %v280_v39 }
  0xef   : > { %1080 = vmatpush1.bf16.xpose.msra.mxu0 %v1969_v43  ;;  %v1978_v23 = vpack.c.bf16 %v928_v6, %v924_v52  ;;  %1144 = vmatprep.subr.bf16.mxu1 %v1972_v55  ;;  %v528_v1 = vmul.f32 %v1679_v59, %v460_v47  ;;  %v786_v17 = vmul.f32 %v1683_v61, %v720_v8  ;;  %vm244_vm3 = vcmask 523264  }
  0xf0   : > { %v787_v50 = vmul.f32 %v1685_v62, %v720_v8  ;;  %v422_v24 = vadd.f32 %v385_v29, %v350_v42  ;;  %v423_v35 = vadd.f32 %v385_v29, %v351_v9  ;;  %v424_v22 = vadd.f32 %v385_v29, %v352_v49 }
  0xf1   : > { %1145 = vmatpush1.bf16.xpose.msra.mxu1 %v1978_v23  ;;  %v427_v25 = vadd.f32 %v1898_v34, %v355_v32  ;;  %v428_v41 = vadd.f32 %v1898_v34, %v356_v53  ;;  %v789_v10 = vmul.f32 %v1689_v0, %v720_v8  ;;  %v429_v42 = vadd.f32 %v1898_v34, %v357_v45 }
  0xf2   : > { %v456_v40 = vpop.permute.xlu1 %455  ;;  %v529_v9 = vmul.f32 %v1681_v60, %v460_v47  ;;  %v788_v49 = vmul.f32 %v1687_v63, %v720_v8  ;;  %v986_v32 = vunpack.c.l.bf16 %v1906_v37  ;;  %v987_v53 = vunpack.c.l.bf16 %v1900_v48 }
  0xf3   : > { %v522_v27 = vmul.f32 %v1675_v57, %v456_v40  ;;  %v523_v31 = vmul.f32 %v1677_v58, %v456_v40  ;;  %v524_v26 = vmul.f32 %v1679_v59, %v456_v40  ;;  %v525_v51 = vmul.f32 %v1681_v60, %v456_v40 }
  0xf4   : > { %v425_v57 = vadd.f32 %v385_v29, %v353_v18  ;;  %v426_v58 = vadd.f32 %v1898_v34, %v354_v21  ;;  %v559_v6 = vadd.f32 %v527_v54, %v427_v25  ;;  %v560_v40 = vadd.f32 %v528_v1, %v428_v41 }
  0xf5   : > { %v554_v39 = vadd.f32 %v522_v27, %v422_v24  ;;  %v555_v59 = vadd.f32 %v523_v31, %v423_v35  ;;  %v556_v16 = vadd.f32 %v524_v26, %v424_v22  ;;  %v979_v45 = vunpack.c.l.bf16 %v1956_v15 }
  0xf6   : > { %v557_v46 = vadd.f32 %v525_v51, %v425_v57  ;;  %v558_v52 = vadd.f32 %v526_v7, %v426_v58  ;;  %v561_v51 = vadd.f32 %v529_v9, %v429_v42  ;;  %v978_v25 = vunpack.c.l.bf16 %v1969_v43 }
  0xf7   : > { %v588_v56 = vpop.permute.xlu1 %587  ;;  %v982_v41 = vunpack.c.h.bf16 %v1969_v43 }
  0xf8   : > { %v654_v19 = vmul.f32 %v1693_v2, %v588_v56  ;;  %v655_v14 = vmul.f32 %v1695_v3, %v588_v56  ;;  %v656_v20 = vmul.f32 %v1697_v4, %v588_v56  ;;  %v657_v29 = vmul.f32 %v1699_v5, %v588_v56 }
  0xfa   : > { %v686_v18 = vadd.f32 %v654_v19, %v554_v39  ;;  %v687_v44 = vadd.f32 %v655_v14, %v555_v59  ;;  %v688_v30 = vadd.f32 %v656_v20, %v556_v16  ;;  %v689_v38 = vadd.f32 %v657_v29, %v557_v46 }
  0xfb   : > { %v592_v21 = vpop.permute.xlu1 %591 }
  0xfc   : > { %v818_v27 = vadd.f32 %v786_v17, %v686_v18  ;;  %v819_v31 = vadd.f32 %v787_v50, %v687_v44  ;;  %v821_v26 = vadd.f32 %v789_v10, %v689_v38  ;;  %v658_v34 = vmul.f32 %v1693_v2, %v592_v21 }
  0xfd   : > { %v659_v60 = vmul.f32 %v1695_v3, %v592_v21  ;;  %v660_v47 = vmul.f32 %v1697_v4, %v592_v21  ;;  %v661_v8 = vmul.f32 %v1699_v5, %v592_v21  ;;  %v820_v7 = vadd.f32 %v788_v49, %v688_v30 }
  0xfe   : > { %v882_v54 = vmul.f32 0.2, %v818_v27  ;;  %v883_v24 = vmul.f32 0.2, %v819_v31  ;;  %v885_v35 = vmul.f32 0.2, %v821_v26  ;;  %v690_v22 = vadd.f32 %v658_v34, %v558_v52 }
  0xff   : > { %v691_v1 = vadd.f32 %v659_v60, %v559_v6  ;;  %v692_v17 = vadd.f32 %v660_v47, %v560_v40  ;;  %v693_v50 = vadd.f32 %v661_v8, %v561_v51  ;;  %vm851_vm10 = vcmp.gt.f32.partialorder %v819_v31, 0.0 }
 0x100   : > { %v724_v57 = vpop.permute.xlu1 %723  ;;  %vm853_vm11 = vcmp.gt.f32.partialorder %v821_v26, 0.0  ;;  %v884_v58 = vmul.f32 0.2, %v820_v7  ;;  %vm850_vm12 = vcmp.gt.f32.partialorder %v818_v27, 0.0  ;;  %v915_v46 = vsel %vm851_vm10, %v819_v31, %v883_v24 }
 0x101   : > { %v790_v2 = vmul.f32 %v1683_v61, %v724_v57  ;;  %v791_v3 = vmul.f32 %v1685_v62, %v724_v57  ;;  %v792_v4 = vmul.f32 %v1687_v63, %v724_v57  ;;  %v793_v5 = vmul.f32 %v1689_v0, %v724_v57 }
 0x102   : > { %v917_v56 = vsel %vm853_vm11, %v821_v26, %v885_v35  ;;  %vm852_vm13 = vcmp.gt.f32.partialorder %v820_v7, 0.0  ;;  %v983_v61 = vunpack.c.h.bf16 %v1956_v15  ;;  %v914_v14 = vsel %vm850_vm12, %v818_v27, %v882_v54 }
 0x103   : > { %v822_v10 = vadd.f32 %v790_v2, %v690_v22  ;;  %v823_v39 = vadd.f32 %v791_v3, %v691_v1  ;;  %v824_v59 = vadd.f32 %v792_v4, %v692_v17  ;;  %v825_v16 = vadd.f32 %v793_v5, %v693_v50 }
 0x104   : > { %v916_v42 = vsel %vm852_vm13, %v820_v7, %v884_v58  ;;  %v990_v52 = vunpack.c.h.bf16 %v1906_v37  ;;  %v991_v6 = vunpack.c.h.bf16 %v1900_v48  ;;  %v1012_v26 = vadd.f32 %v979_v45, %v978_v25 }
 0x105   : > { %v886_v62 = vmul.f32 0.2, %v822_v10  ;;  %v887_v19 = vmul.f32 0.2, %v823_v39  ;;  %v888_v63 = vmul.f32 0.2, %v824_v59  ;;  %v1017_v34 = vadd.f32 %v983_v61, %v982_v41 }
 0x106   : > { %v889_v0 = vmul.f32 0.2, %v825_v16  ;;  %vm855_vm14 = vcmp.gt.f32.partialorder %v823_v39, 0.0  ;;  %vm857_vm15 = vcmp.gt.f32.partialorder %v825_v16, 0.0  ;;  %vm854_vm1 = vcmp.gt.f32.partialorder %v822_v10, 0.0 }
 0x107   : > { %v919_v20 = vsel %vm855_vm14, %v823_v39, %v887_v19  ;;  %v918_v29 = vsel %vm854_vm1, %v822_v10, %v886_v62  ;;  %vm856_vm2 = vcmp.gt.f32.partialorder %v824_v59, 0.0  ;;  %v980_v7 = vunpack.c.l.bf16 %v1978_v23 }
 0x108   : > { %v947_v9 = vpack.c.bf16 %v919_v20, %v915_v46  ;;  %v921_v49 = vsel %vm857_vm15, %v825_v16, %v889_v0  ;;  %v946_v18 = vpack.c.bf16 %v918_v29, %v914_v14  ;;  %v920_v44 = vsel %vm856_vm2, %v824_v59, %v888_v63 }
 0x109   : > { %v949_v30 = vpack.c.bf16 %v921_v49, %v917_v56  ;;  %v948_v38 = vpack.c.bf16 %v920_v44, %v916_v42  ;;  %v984_v54 = vunpack.c.h.bf16 %v1978_v23  ;;  %v1022_v24 = vadd.f32 %v987_v53, %v986_v32 }
 0x10a   : > { %1081 = vmatprep.subr.bf16.mxu0 %v947_v9  ;;  %1099 = vmatprep.mubr.bf16.mxu0 %v947_v9  ;;  %v974_v21 = vunpack.c.h.bf16 %v946_v18  ;;  %v975_v40 = vunpack.c.h.bf16 %v947_v9  ;;  %v970_v27 = vunpack.c.l.bf16 %v946_v18  ;;  %v971_v31 = vunpack.c.l.bf16 %v947_v9 }
 0x10b   : > { %1146 = vmatprep.subr.bf16.mxu1 %v949_v30  ;;  %1164 = vmatprep.mubr.bf16.mxu1 %v949_v30  ;;  %v976_v60 = vunpack.c.h.bf16 %v948_v38  ;;  %v972_v8 = vunpack.c.l.bf16 %v948_v38  ;;  %v1027_v35 = vadd.f32 %v991_v6, %v990_v52  ;;  %v977_v22 = vunpack.c.h.bf16 %v949_v30  ;;  %v967_v52 = vld [vmem:[%s1786_s12 + $0x28] sm:$0xff] }
 0x10c   : > { %1082 = vmatpush1.bf16.xpose.msra.mxu0 %v946_v18  ;;  %1147 = vmatpush1.bf16.xpose.msra.mxu1 %v948_v38  ;;  %v1007_v47 = vadd.f32 %v975_v40, %v974_v21  ;;  %v1002_v51 = vadd.f32 %v971_v31, %v970_v27  ;;  %v973_v45 = vunpack.c.l.bf16 %v949_v30  ;;  %v1013_v50 = vadd.f32 %v1012_v26, %v980_v7  ;;  %v968_v31 = vld [vmem:[%s1786_s12 + $0x30] sm:$0xff]  ;;  %v969_v26 = vld [vmem:[%s1786_s12 + $0x38] sm:$0xff] }
 0x10d   : > { %v994_v57 = vunpack.c.l.bf16 %v1872_v36  ;;  %v995_v2 = vunpack.c.l.bf16 %v1856_v12  ;;  %v998_v3 = vunpack.c.h.bf16 %v1872_v36  ;;  %v1018_v58 = vadd.f32 %v1017_v34, %v984_v54 }
 0x10e   : > { %v1008_v1 = vadd.f32 %v1007_v47, %v976_v60  ;;  %v1003_v17 = vadd.f32 %v1002_v51, %v972_v8  ;;  %v999_v25 = vunpack.c.h.bf16 %v1856_v12  ;;  %v988_v41 = vunpack.c.l.bf16 %v1910_v28 }
 0x10f   : > { %v992_v32 = vunpack.c.h.bf16 %v1910_v28  ;;  %v981_v53 = vunpack.c.l.bf16 %v1972_v55  ;;  %v985_v10 = vunpack.c.h.bf16 %v1972_v55  ;;  %v1032_v16 = vadd.f32 %v995_v2, %v994_v57 }
 0x110   : > { %v1009_v4 = vadd.f32 %v1008_v1, %v977_v22  ;;  %v1004_v5 = vadd.f32 %v1003_v17, %v973_v45  ;;  %v1023_v39 = vadd.f32 %v1022_v24, %v988_v41  ;;  %v1037_v61 = vadd.f32 %v999_v25, %v998_v3 }
 0x111   : > { %v1028_v59 = vadd.f32 %v1027_v35, %v992_v32  ;;  %v1014_v46 = vadd.f32 %v1013_v50, %v981_v53  ;;  %v1019_v56 = vadd.f32 %v1018_v58, %v985_v10  ;;  %v989_v62 = vunpack.c.l.bf16 %v1903_v33 }
 0x112   : > { %1010 = vadd.xlane.f32.xlu0 %v1009_v4  ;;  %1005 = vadd.xlane.f32.xlu1 %v1004_v5  ;;  %v993_v19 = vunpack.c.h.bf16 %v1903_v33  ;;  %v996_v63 = vunpack.c.l.bf16 %v1880_v11  ;;  %v1000_v14 = vunpack.c.h.bf16 %v1880_v11 }
 0x113   : > { %1100 = vmatmul.mubr.bf16.vlgmr.msra.gmra.mxu0 %v946_v18  ;;  %1165 = vmatmul.mubr.bf16.vlgmr.msra.gmra.mxu1 %v948_v38  ;;  %v1024_v0 = vadd.f32 %v1023_v39, %v989_v62  ;;  %v966_v38 = vld [vmem:[%s1786_s12 + $0x20] sm:$0xff] }
 0x114   : > { %1107 = vmatprep.mubr.bf16.mxu0 %v1956_v15  ;;  %1172 = vmatprep.mubr.bf16.mxu1 %v1972_v55  ;;  %v1029_v20 = vadd.f32 %v1028_v59, %v993_v19  ;;  %v1033_v29 = vadd.f32 %v1032_v16, %v996_v63  ;;  %v1038_v42 = vadd.f32 %v1037_v61, %v1000_v14  ;;  %v997_v15 = vunpack.c.l.bf16 %v1862_v13 }
 0x115   : > { %v1001_v55 = vunpack.c.h.bf16 %v1862_v13 }
 0x116   : > { %1015 = vadd.xlane.f32.xlu0 %v1014_v46  ;;  %1020 = vadd.xlane.f32.xlu1 %v1019_v56  ;;  %v1034_v9 = vadd.f32 %v1033_v29, %v997_v15 }
 0x117   : > { %v1039_v49 = vadd.f32 %v1038_v42, %v1001_v55 }
 0x11a   : > { %1025 = vadd.xlane.f32.xlu0 %v1024_v0  ;;  %1030 = vadd.xlane.f32.xlu1 %v1029_v20 }
 0x11b   : > { %1108 = vmatmul.mubr.bf16.gmra.mxu0 %v1969_v43  ;;  %1173 = vmatmul.mubr.bf16.gmra.mxu1 %v1978_v23  ;;  %v965_v43 = vld [vmem:[%s1786_s12 + $0x18] sm:$0xff] }
 0x11c   : > { %1115 = vmatprep.mubr.bf16.mxu0 %v1900_v48  ;;  %1180 = vmatprep.mubr.bf16.mxu1 %v1903_v33  ;;  %v2215_v48 = vmov 0.0  }
 0x11d   : > { %245 = vst.msk [vmem:[%s2052_s21] sm:$0xff] %vm244_vm3, %v2215_v48  ;;  %246 = vst.msk [vmem:[%s2052_s21 + $0x8] sm:$0xff] %vm244_vm3, %v2215_v48 }
 0x11e   : > { %1035 = vadd.xlane.f32.xlu0 %v1034_v9  ;;  %1040 = vadd.xlane.f32.xlu1 %v1039_v49  ;;  %247 = vst.msk [vmem:[%s2052_s21 + $0x10] sm:$0xff] %vm244_vm3, %v2215_v48  ;;  %248 = vst.msk [vmem:[%s2052_s21 + $0x18] sm:$0xff] %vm244_vm3, %v2215_v48 }
 0x11f   : > { %249 = vst.msk [vmem:[%s2052_s21 + $0x20] sm:$0xff] %vm244_vm3, %v2215_v48  ;;  %250 = vst.msk [vmem:[%s2052_s21 + $0x28] sm:$0xff] %vm244_vm3, %v2215_v48 }
 0x120   : > { %251 = vst.msk [vmem:[%s2052_s21 + $0x30] sm:$0xff] %vm244_vm3, %v2215_v48  ;;  %252 = vst.msk [vmem:[%s2052_s21 + $0x38] sm:$0xff] %vm244_vm3, %v2215_v48 }
 0x123   : > { %1116 = vmatmul.mubr.bf16.gmra.mxu0 %v1906_v37  ;;  %1181 = vmatmul.mubr.bf16.gmra.mxu1 %v1910_v28  ;;  %v964_v28 = vld [vmem:[%s1786_s12 + $0x10] sm:$0xff] }
 0x124   : > { %1123 = vmatprep.mubr.bf16.mxu0 %v1856_v12  ;;  %1188 = vmatprep.mubr.bf16.mxu1 %v1862_v13  ;;  %v963_v12 = vld [vmem:[%s1786_s12 + $0x8] sm:$0xff]  ;;  %v962_v13 = vld [vmem:[%s1786_s12] sm:$0xff] }
 0x125   : > { %v1059_v7 = vld [vmem:[%s2052_s21] sm:$0xff]  ;;  %v1060_v17 = vld [vmem:[%s2052_s21 + $0x8] sm:$0xff]  ;;  %v1061_v58 = vld [vmem:[%s2052_s21 + $0x10] sm:$0xff] }
 0x126   : > { %v1062_v59 = vld [vmem:[%s2052_s21 + $0x18] sm:$0xff]  ;;  %v1063_v63 = vld [vmem:[%s2052_s21 + $0x20] sm:$0xff]  ;;  %v1064_v55 = vld [vmem:[%s2052_s21 + $0x28] sm:$0xff] }
 0x12b   : > { %1124 = vmatmul.mubr.bf16.gmra.mxu0 %v1872_v36  ;;  %1189 = vmatmul.mubr.bf16.gmra.mxu1 %v1880_v11 }
 0x19b   : > { %v1011_v36 = vpop.xlane.xlu0 %1010  ;;  %v1006_v11 = vpop.xlane.xlu1 %1005 }
 0x19c   : > { %v1043_v33 = vadd.f32 %v1011_v36, %v963_v12  ;;  %v1042_v37 = vadd.f32 %v1006_v11, %v962_v13  ;;  %v1065_v11 = vld [vmem:[%s2052_s21 + $0x30] sm:$0xff] }
 0x19e   : > { %1052 = vst.msk [vmem:[%s1786_s12 + $0x8] sm:$0xff] %vm235_vm0, %v1043_v33  ;;  %1051 = vst.msk [vmem:[%s1786_s12] sm:$0xff] %vm235_vm0, %v1042_v37 }
 0x19f   : > { %v1016_v23 = vpop.xlane.xlu0 %1015  ;;  %v1021_v18 = vpop.xlane.xlu1 %1020 }
 0x1a0   : > { %v1044_v44 = vadd.f32 %v1016_v23, %v964_v28  ;;  %v1045_v30 = vadd.f32 %v1021_v18, %v965_v43 }
 0x1a2   : > { %1053 = vst.msk [vmem:[%s1786_s12 + $0x10] sm:$0xff] %vm235_vm0, %v1044_v44  ;;  %1054 = vst.msk [vmem:[%s1786_s12 + $0x18] sm:$0xff] %vm235_vm0, %v1045_v30  ;;  %v1066_v44 = vld [vmem:[%s2052_s21 + $0x38] sm:$0xff] }
 0x1a3   : > { %v1026_v6 = vpop.xlane.xlu0 %1025  ;;  %v1031_v21 = vpop.xlane.xlu1 %1030 }
 0x1a4   : > { %v1046_v40 = vadd.f32 %v1026_v6, %v966_v38  ;;  %v1047_v27 = vadd.f32 %v1031_v21, %v967_v52 }
 0x1a6   : > { %1055 = vst.msk [vmem:[%s1786_s12 + $0x20] sm:$0xff] %vm235_vm0, %v1046_v40  ;;  %1056 = vst.msk [vmem:[%s1786_s12 + $0x28] sm:$0xff] %vm235_vm0, %v1047_v27 }
 0x1a7   : > { %v1036_v34 = vpop.xlane.xlu0 %1035  ;;  %v1041_v60 = vpop.xlane.xlu1 %1040 }
 0x1a8   : > { %v1048_v47 = vadd.f32 %v1036_v34, %v968_v31  ;;  %v1049_v8 = vadd.f32 %v1041_v60, %v969_v26 }
 0x1aa   : > { %1057 = vst.msk [vmem:[%s1786_s12 + $0x30] sm:$0xff] %vm235_vm0, %v1048_v47  ;;  %1058 = vst.msk [vmem:[%s1786_s12 + $0x38] sm:$0xff] %vm235_vm0, %v1049_v8 }
 0x1d3   : > { %v1101_v51 = vpop.f32.mrf.mxu0  ;;  %v1166_v54 = vpop.f32.mrf.mxu1 }
 0x1d4   : > { %v1167_v24 = vadd.f32 %v1166_v54, %v1101_v51 }
 0x1d5   : > { %v1103_v35 = vpop.f32.mrf.mxu0  ;;  %v1168_v22 = vpop.f32.mrf.mxu1 }
 0x1d6   : > { %v1197_v1 = vadd.f32 %v1167_v24, %v1059_v7 }
 0x1d7   : > { %v1104_v45 = vpop.f32.mrf.mxu0  ;;  %v1169_v50 = vpop.f32.mrf.mxu1 }
 0x1d8   : > { %1206 = vst.msk [vmem:[%s2052_s21] sm:$0xff] %vm244_vm3, %v1197_v1  ;;  %v1170_v57 = vadd.f32 %v1169_v50, %v1104_v45 }
 0x1d9   : > { %v1106_v2 = vpop.f32.mrf.mxu0  ;;  %v1171_v3 = vpop.f32.mrf.mxu1 }
 0x1da   : > { %v1198_v4 = vadd.f32 %v1170_v57, %v1060_v17 }
 0x1db   : > { %v1109_v5 = vpop.f32.mrf.mxu0  ;;  %v1174_v25 = vpop.f32.mrf.mxu1 }
 0x1dc   : > { %1207 = vst.msk [vmem:[%s2052_s21 + $0x8] sm:$0xff] %vm244_vm3, %v1198_v4  ;;  %v1175_v41 = vadd.f32 %v1174_v25, %v1109_v5 }
 0x1dd   : > { %v1111_v32 = vpop.f32.mrf.mxu0  ;;  %v1176_v53 = vpop.f32.mrf.mxu1 }
 0x1de   : > { %v1199_v10 = vadd.f32 %v1175_v41, %v1061_v58 }
 0x1df   : > { %v1112_v39 = vpop.f32.mrf.mxu0  ;;  %v1177_v16 = vpop.f32.mrf.mxu1 }
 0x1e0   : > { %1208 = vst.msk [vmem:[%s2052_s21 + $0x10] sm:$0xff] %vm244_vm3, %v1199_v10  ;;  %v1178_v46 = vadd.f32 %v1177_v16, %v1112_v39 }
 0x1e1   : > { %v1114_v56 = vpop.f32.mrf.mxu0  ;;  %v1179_v61 = vpop.f32.mrf.mxu1 }
 0x1e2   : > { %v1200_v62 = vadd.f32 %v1178_v46, %v1062_v59 }
 0x1e3   : > { %v1117_v19 = vpop.f32.mrf.mxu0  ;;  %v1182_v14 = vpop.f32.mrf.mxu1 }
 0x1e4   : > { %1209 = vst.msk [vmem:[%s2052_s21 + $0x18] sm:$0xff] %vm244_vm3, %v1200_v62  ;;  %v1183_v0 = vadd.f32 %v1182_v14, %v1117_v19 }
 0x1e5   : > { %v1119_v20 = vpop.f32.mrf.mxu0  ;;  %v1184_v29 = vpop.f32.mrf.mxu1 }
 0x1e6   : > { %v1201_v42 = vadd.f32 %v1183_v0, %v1063_v63 }
 0x1e7   : > { %v1120_v15 = vpop.f32.mrf.mxu0  ;;  %v1185_v9 = vpop.f32.mrf.mxu1 }
 0x1e8   : > { %1210 = vst.msk [vmem:[%s2052_s21 + $0x20] sm:$0xff] %vm244_vm3, %v1201_v42  ;;  %v1186_v49 = vadd.f32 %v1185_v9, %v1120_v15 }
 0x1e9   : > { %v1122_v48 = vpop.f32.mrf.mxu0  ;;  %v1187_v12 = vpop.f32.mrf.mxu1 }
 0x1ea   : > { %v1202_v13 = vadd.f32 %v1186_v49, %v1064_v55 }
 0x1eb   : > { %v1125_v36 = vpop.f32.mrf.mxu0  ;;  %v1190_v33 = vpop.f32.mrf.mxu1 }
 0x1ec   : > { %1211 = vst.msk [vmem:[%s2052_s21 + $0x28] sm:$0xff] %vm244_vm3, %v1202_v13  ;;  %v1191_v37 = vadd.f32 %v1190_v33, %v1125_v36 }
 0x1ed   : > { %v1127_v28 = vpop.f32.mrf.mxu0  ;;  %v1192_v43 = vpop.f32.mrf.mxu1 }
 0x1ee   : > { %v1203_v23 = vadd.f32 %v1191_v37, %v1065_v11 }
 0x1ef   : > { %v1128_v18 = vpop.f32.mrf.mxu0  ;;  %v1193_v30 = vpop.f32.mrf.mxu1 }
 0x1f0   : > { %1212 = vst.msk [vmem:[%s2052_s21 + $0x30] sm:$0xff] %vm244_vm3, %v1203_v23  ;;  %v1194_v38 = vadd.f32 %v1193_v30, %v1128_v18 }
 0x1f1   : > { %v1130_v52 = vpop.f32.mrf.mxu0  ;;  %v1195_v6 = vpop.f32.mrf.mxu1 }
 0x1f2   : > { %v1204_v21 = vadd.f32 %v1194_v38, %v1066_v44 }
 0x1f4   : > { %1213 = vst.msk [vmem:[%s2052_s21 + $0x38] sm:$0xff] %vm244_vm3, %v1204_v21 }
 0x1f5   : > { %1445 = shalt.err (!%p1442_p6)
}
 0x1f6   : > { %s1446_s9 = scalar_lea.hbm %s2129_s30, 1024  ;;  %s1450_s12 = scalar_lea.hbm %s2186_s4, 2048 }
 0x1f7   : > { %p1447_p7 = scmp.ne.s32.totalorder %s2129_s30, %s1446_s9  ;;  %p1451_p11 = scmp.lt.s32.totalorder %s2129_s30, %s2186_s4 }
 0x1f8   : > { %p1452_p12 = scmp.lt.s32.totalorder %s1450_s12, %s1446_s9 }
 0x1f9   : > { %p1448_p9 = pnand %p1447_p7, %p1583_p4 }
 0x1fa   : > { %p1453_p13 = por %p1452_p12, %p1451_p11 }
 0x1fb   : > { %p1449_p10 = pneg %p1448_p9 }
 0x1fd   : > { %p1454_p0 = pnand %p1453_p13, %p1449_p10 }
 0x1ff   : > { %1457 = shalt.err (!%p1454_p0)
}
 0x200   : > { %s1516_s21 = smov 128   ;;  %s1517_s22 = smov 8  }
 0x201   : > { %1348 = dma.vmem_to_hbm [thread:$0]  (%p1583_p4), %s2131_s24, 1024, %s2129_s30, %s2137_s18, %s1516_s21, %s1516_s21, %s1517_s22  }
 0x202 PF: > { %p1354_p1 = scmp.ge.s32.totalorder %s1508_s20, 2  ;;  %s1259_s26 = sand.u32 1, %s1488_s15  }
 0x203   : > { %s1260_s29 = scalar_lea.sflag [#allocation3], %s1259_s26 }
 0x204   : > { %p1351_p2 = pnand %p1354_p1, %p1590_p8 }
 0x206   : > { %p1352_p3 = pneg %p1351_p2 }
 0x208   : > { %1483 = dma.done.wait (%p1352_p3), %s1260_s29, 1024  }
 0x209   : > { %1485 = vsyncadd (%p1352_p3), %s1260_s29, 4294966272  ;;  %s18_s20 = sadd.s32 1, %s1508_s20   ;;  %s2216_s15 = smov %s1492_s16 }
 0x20a   : > { %p15_p5 = scmp.ge.s32.totalorder %s18_s20, 4   ;;  %s2217_s16 = smov %s1496_s17 }
 0x20b   : > { %s2218_s17 = smov %s1596_s28  ;;  %s2219_s18 = smov %s1504_s19 }
 0x20c   : > { %s2220_s19 = smov %s2222_s23  ;;  %17 = sbr.rel (!%p15_p5) target bundleno = 4 (0x4), region = 83 }
 0x211   :  { %1265 = vsyncpa [#allocation3], 1 }
 0x212   :  { %1267 = vsyncpa [#allocation3 + $0x1], 1 }

</bundles_post_ra>
